<compile_context>
chip_gen: v7x
topology: tpu7x:2x2x1
jax: 0.10.0
libtpu: 0.0.40
codegen_flags: <defaults>
</compile_context>

<pallas_src>
import functools

import jax
import jax.numpy as jnp
from jax.experimental import pallas as pl
from jax.experimental.pallas import tpu as pltpu

HIDDEN = 128


def _round_up(n, m):
    return ((n + m - 1) // m) * m


def actor_critic_kernel(x_ref, w1_ref, b1_ref, w2_ref, b2_ref, wac_ref, bac_ref,
                        out_ref, *, output_dim):
    # fc1 + relu (MXU in the weights' dtype, f32 accumulate, f32 bias/ReLU)
    h1 = jnp.maximum(
        jnp.dot(x_ref[...], w1_ref[...], preferred_element_type=jnp.float32)
        + b1_ref[...], 0.0)
    # fc2 + relu
    h2 = jnp.maximum(
        jnp.dot(h1.astype(w2_ref.dtype), w2_ref[...],
                preferred_element_type=jnp.float32)
        + b2_ref[...], 0.0)
    # fused actor|critic head: z[:, :A] = actor logits, z[:, A] = critic value,
    # z[:, A+1:] = zero padding lanes.
    z = (jnp.dot(h2.astype(wac_ref.dtype), wac_ref[...],
                 preferred_element_type=jnp.float32)
         + bac_ref[...])
    # Actor mask from a (1, lanes) iota; broadcasting handles the rows (no
    # (TB, lanes) int32 temporary).
    lane = jax.lax.broadcasted_iota(jnp.int32, (1, z.shape[-1]), 1)
    actor_mask = lane < output_dim
    # Numerically stable masked softmax over the actor lanes only.  The clamp
    # keeps exp() finite on the critic / padding lanes before masking.
    m = jnp.max(jnp.where(actor_mask, z, -jnp.inf), axis=-1, keepdims=True)
    e = jnp.where(actor_mask, jnp.exp(jnp.minimum(z - m, 0.0)), 0.0)
    denom = jnp.sum(e, axis=-1, keepdims=True)
    probs = e / denom  # exact divide: DMA-bound kernel, the extra VPU work is free
    # Lane-dense unmasked store: actor probs in lanes [0:A], critic/padding keep z.
    out_ref[...] = jnp.where(actor_mask, probs, z)


def _pick_batch_tile(B, input_dim, lanes, in_itemsize, *, max_tile=1024,
                     vmem_budget=12 * 1024 * 1024):
    """Pick a batch tile and an explicit VMEM limit.

    The budget (~12 MiB) keeps the kernel safely under v5e's 16 MiB scoped
    default; v6e/v7x have more headroom.  Also keeps >=2 grid steps over the
    "parallel" batch axis when B allows it so v7x's second TensorCore is fed.
    """
    # Resident weights + biases (the pipeline double-buffers even constant-index
    # blocks; on v7x with huge input_dim one could use pl.Buffered(1) here).
    weight_bytes = 2 * (input_dim * HIDDEN + HIDDEN * HIDDEN + HIDDEN * lanes) * in_itemsize
    bias_bytes = 2 * (2 * HIDDEN + lanes) * 4
    # Per batch-row: double-buffered x block + double-buffered f32 out block
    # + in-kernel f32 temporaries (h1, h2, z, e: ~4 row-tiles of width <= lanes).
    per_row = 2 * input_dim * in_itemsize + 2 * lanes * 4 + 4 * max(HIDDEN, lanes) * 4
    avail = max(vmem_budget - weight_bytes - bias_bytes, 8 * per_row)
    # Sublane alignment: 8 rows for f32 x blocks, 16 for bf16-packed x blocks.
    align = 8 if in_itemsize >= 4 else 16
    tb = max(align, (min(max_tile, avail // per_row) // align) * align)
    # v7x megacore: keep at least 2 grid steps when the batch can be split.
    tb = min(tb, max(align, _round_up(pl.cdiv(B, 2), align)))
    if tb >= B:
        tb = _round_up(B, 8)  # single (full-batch) block
    est = weight_bytes + bias_bytes + tb * per_row
    vmem_limit = int(min(64 * 1024 * 1024, max(2 * est, 16 * 1024 * 1024)))
    return int(tb), vmem_limit


def prepare_params(params, *, compute_dtype=jnp.bfloat16):
    """One-time parameter prep: pack the actor|critic head lane-dense and cast
    the matmul weights to the compute dtype.  Do NOT call this per forward."""
    output_dim = params["wa"].shape[1]
    lanes = max(128, _round_up(output_dim + 1, 128))

    wac = jnp.zeros((HIDDEN, lanes), jnp.float32)
    wac = wac.at[:, :output_dim].set(params["wa"])
    wac = wac.at[:, output_dim].set(params["wc"][:, 0])
    bac = jnp.zeros((1, lanes), jnp.float32)
    bac = bac.at[:, :output_dim].set(params["ba"])
    bac = bac.at[:, output_dim].set(params["bc"][:, 0])

    return dict(
        w1=params["w1"].astype(compute_dtype),
        b1=params["b1"].astype(jnp.float32),
        w2=params["w2"].astype(compute_dtype),
        b2=params["b2"].astype(jnp.float32),
        wac=wac.astype(compute_dtype),
        bac=bac,
        output_dim=output_dim,
        lanes=lanes,
    )


def actor_critic_forward(x, prepared, *, max_tile=1024):
    """x: (B, input_dim) float32. `prepared` comes from prepare_params()."""
    B, input_dim = x.shape
    output_dim = prepared["output_dim"]
    lanes = prepared["lanes"]
    compute_dtype = prepared["w1"].dtype
    in_itemsize = jnp.dtype(compute_dtype).itemsize

    TB, vmem_limit = _pick_batch_tile(B, input_dim, lanes, in_itemsize,
                                      max_tile=max_tile)
    grid = (pl.cdiv(B, TB),)  # ragged last block: OOB output rows never written

    xc = x.astype(compute_dtype)  # halves the dominant x read when bf16
    kernel = functools.partial(actor_critic_kernel, output_dim=output_dim)

    out = pl.pallas_call(
        kernel,
        out_shape=jax.ShapeDtypeStruct((B, lanes), jnp.float32),
        grid=grid,
        in_specs=[
            pl.BlockSpec((TB, input_dim), lambda i: (i, 0)),      # x: batch-tiled
            pl.BlockSpec((input_dim, HIDDEN), lambda i: (0, 0)),  # w1: resident
            pl.BlockSpec((1, HIDDEN), lambda i: (0, 0)),          # b1
            pl.BlockSpec((HIDDEN, HIDDEN), lambda i: (0, 0)),     # w2
            pl.BlockSpec((1, HIDDEN), lambda i: (0, 0)),          # b2
            pl.BlockSpec((HIDDEN, lanes), lambda i: (0, 0)),      # fused wa|wc
            pl.BlockSpec((1, lanes), lambda i: (0, 0)),           # fused ba|bc
        ],
        out_specs=pl.BlockSpec((TB, lanes), lambda i: (i, 0)),
        compiler_params=pltpu.CompilerParams(
            dimension_semantics=("parallel",),
            vmem_limit_bytes=vmem_limit),
    )(xc, prepared["w1"], prepared["b1"], prepared["w2"], prepared["b2"],
      prepared["wac"], prepared["bac"])

    actor = out[:, :output_dim]
    critic = out[:, output_dim:output_dim + 1]
    return actor, critic


def init_params(key, input_dim, output_dim):
    """Deterministic init mimicking nn.Linear's uniform(-1/sqrt(fan_in), 1/sqrt(fan_in))."""
    ks = jax.random.split(key, 8)

    def linear(kw, kb, fan_in, fan_out):
        bound = 1.0 / jnp.sqrt(jnp.float32(fan_in))
        w = jax.random.uniform(kw, (fan_in, fan_out), jnp.float32, -bound, bound)
        b = jax.random.uniform(kb, (1, fan_out), jnp.float32, -bound, bound)
        return w, b

    w1, b1 = linear(ks[0], ks[1], input_dim, HIDDEN)
    w2, b2 = linear(ks[2], ks[3], HIDDEN, HIDDEN)
    wa, ba = linear(ks[4], ks[5], HIDDEN, output_dim)
    wc, bc = linear(ks[6], ks[7], HIDDEN, 1)
    return dict(w1=w1, b1=b1, w2=w2, b2=b2, wa=wa, ba=ba, wc=wc, bc=bc)


def reference_forward(x, p):
    h1 = jnp.maximum(x @ p["w1"] + p["b1"], 0.0)
    h2 = jnp.maximum(h1 @ p["w2"] + p["b2"], 0.0)
    logits = h2 @ p["wa"] + p["ba"]
    actor = jax.nn.softmax(logits, axis=-1)
    critic = h2 @ p["wc"] + p["bc"]
    return actor, critic


if __name__ == "__main__":
    key = jax.random.PRNGKey(0)
    k_x, k_p = jax.random.split(key)

    batch, input_dim, output_dim = 8, 16, 8
    x = jax.random.normal(k_x, (batch, input_dim), jnp.float32)
    params = init_params(k_p, input_dim, output_dim)
    actor_ref, critic_ref = reference_forward(x, params)

    # 1) f32 compute path: exact-precision check against the plain-JAX reference.
    prep_f32 = prepare_params(params, compute_dtype=jnp.float32)
    actor32, critic32 = actor_critic_forward(x, prep_f32)
    jax.block_until_ready((actor32, critic32))
    assert actor32.shape == (batch, output_dim)
    assert critic32.shape == (batch, 1)
    assert jnp.allclose(actor32, actor_ref, atol=1e-6, rtol=1e-5)
    assert jnp.allclose(critic32, critic_ref, atol=1e-5, rtol=1e-5)
    assert jnp.allclose(jnp.sum(actor32, axis=-1), 1.0, atol=1e-6)

    # 2) Default bf16-matmul-input path (halved HBM read / better MXU feed).
    prep = prepare_params(params)  # compute_dtype=jnp.bfloat16
    actor, critic = actor_critic_forward(x, prep)
    jax.block_until_ready((actor, critic))
    assert actor.shape == (batch, output_dim)
    assert critic.shape == (batch, 1)
    assert jnp.allclose(actor, actor_ref, atol=2e-2, rtol=2e-2)
    assert jnp.allclose(critic, critic_ref, atol=2e-2, rtol=2e-2)
    assert jnp.allclose(jnp.sum(actor, axis=-1), 1.0, atol=1e-5)

    print("KERNEL_OK")
</pallas_src>

<mosaic_0001>
module attributes {stable_mosaic.version = 11 : i64} {
  func.func @actor_critic_kernel(%arg0: i32, %arg1: memref<8x16xf32, #tpu.memory_space<vmem>>, %arg2: memref<16x128xf32, #tpu.memory_space<vmem>>, %arg3: memref<1x128xf32, #tpu.memory_space<vmem>>, %arg4: memref<128x128xf32, #tpu.memory_space<vmem>>, %arg5: memref<1x128xf32, #tpu.memory_space<vmem>>, %arg6: memref<128x128xf32, #tpu.memory_space<vmem>>, %arg7: memref<1x128xf32, #tpu.memory_space<vmem>>, %arg8: memref<8x128xf32, #tpu.memory_space<vmem>>) attributes {dimension_semantics = [#tpu.dimension_semantics<parallel>], iteration_bounds = array<i64: 1>, scalar_prefetch = 0 : i64, scratch_operands = 0 : i64, tpu.core_type = #tpu.core_type<tc>, window_params = [{transform_indices = @transform_0, window_bounds = array<i64: 8, 16>}, {pipeline_mode = #tpu.pipeline_mode<synchronous>, transform_indices = @transform_1, window_bounds = array<i64: 16, 128>}, {pipeline_mode = #tpu.pipeline_mode<synchronous>, transform_indices = @transform_2, window_bounds = array<i64: 1, 128>}, {pipeline_mode = #tpu.pipeline_mode<synchronous>, transform_indices = @transform_3, window_bounds = array<i64: 128, 128>}, {pipeline_mode = #tpu.pipeline_mode<synchronous>, transform_indices = @transform_4, window_bounds = array<i64: 1, 128>}, {pipeline_mode = #tpu.pipeline_mode<synchronous>, transform_indices = @transform_5, window_bounds = array<i64: 128, 128>}, {pipeline_mode = #tpu.pipeline_mode<synchronous>, transform_indices = @transform_6, window_bounds = array<i64: 1, 128>}, {transform_indices = @transform_7, window_bounds = array<i64: 8, 128>}]} {
    %c0 = arith.constant 0 : index
    %c0_0 = arith.constant 0 : index
    %0 = vector.load %arg1[%c0, %c0_0] : memref<8x16xf32, #tpu.memory_space<vmem>>, vector<8x16xf32>
    %c0_1 = arith.constant 0 : index
    %c0_2 = arith.constant 0 : index
    %1 = vector.load %arg2[%c0_1, %c0_2] : memref<16x128xf32, #tpu.memory_space<vmem>>, vector<16x128xf32>
    %cst = arith.constant dense<0.000000e+00> : vector<8x128xf32>
    %2 = tpu.matmul %0, %1, %cst {dimension_numbers = #tpu.dot_dimension_numbers<[1], [0], [0], [1], [0, 0, 1, 1], [], []>} : vector<8x16xf32>, vector<16x128xf32>, vector<8x128xf32> -> vector<8x128xf32>
    %c0_3 = arith.constant 0 : index
    %c0_4 = arith.constant 0 : index
    %3 = vector.load %arg3[%c0_3, %c0_4] : memref<1x128xf32, #tpu.memory_space<vmem>>, vector<1x128xf32>
    %4 = vector.broadcast %3 : vector<1x128xf32> to vector<8x128xf32>
    %5 = arith.addf %2, %4 : vector<8x128xf32>
    %cst_5 = arith.constant 0.000000e+00 : f32
    %6 = vector.broadcast %cst_5 : f32 to vector<8x128xf32>
    %7 = arith.maximumf %5, %6 : vector<8x128xf32>
    %c0_6 = arith.constant 0 : index
    %c0_7 = arith.constant 0 : index
    %8 = vector.load %arg4[%c0_6, %c0_7] : memref<128x128xf32, #tpu.memory_space<vmem>>, vector<128x128xf32>
    %cst_8 = arith.constant dense<0.000000e+00> : vector<8x128xf32>
    %9 = tpu.matmul %7, %8, %cst_8 {dimension_numbers = #tpu.dot_dimension_numbers<[1], [0], [0], [1], [0, 0, 1, 1], [], []>} : vector<8x128xf32>, vector<128x128xf32>, vector<8x128xf32> -> vector<8x128xf32>
    %c0_9 = arith.constant 0 : index
    %c0_10 = arith.constant 0 : index
    %10 = vector.load %arg5[%c0_9, %c0_10] : memref<1x128xf32, #tpu.memory_space<vmem>>, vector<1x128xf32>
    %11 = vector.broadcast %10 : vector<1x128xf32> to vector<8x128xf32>
    %12 = arith.addf %9, %11 : vector<8x128xf32>
    %cst_11 = arith.constant 0.000000e+00 : f32
    %13 = vector.broadcast %cst_11 : f32 to vector<8x128xf32>
    %14 = arith.maximumf %12, %13 : vector<8x128xf32>
    %c0_12 = arith.constant 0 : index
    %c0_13 = arith.constant 0 : index
    %15 = vector.load %arg6[%c0_12, %c0_13] : memref<128x128xf32, #tpu.memory_space<vmem>>, vector<128x128xf32>
    %cst_14 = arith.constant dense<0.000000e+00> : vector<8x128xf32>
    %16 = tpu.matmul %14, %15, %cst_14 {dimension_numbers = #tpu.dot_dimension_numbers<[1], [0], [0], [1], [0, 0, 1, 1], [], []>} : vector<8x128xf32>, vector<128x128xf32>, vector<8x128xf32> -> vector<8x128xf32>
    %c0_15 = arith.constant 0 : index
    %c0_16 = arith.constant 0 : index
    %17 = vector.load %arg7[%c0_15, %c0_16] : memref<1x128xf32, #tpu.memory_space<vmem>>, vector<1x128xf32>
    %18 = vector.broadcast %17 : vector<1x128xf32> to vector<8x128xf32>
    %19 = arith.addf %16, %18 : vector<8x128xf32>
    %20 = tpu.iota {dimensions = array<i32: 1>} : vector<1x128xi32>
    %c8_i32 = arith.constant 8 : i32
    %21 = vector.broadcast %c8_i32 : i32 to vector<1x128xi32>
    %22 = arith.cmpi slt, %20, %21 : vector<1x128xi32>
    %cst_17 = arith.constant 0xFF800000 : f32
    %23 = vector.shape_cast %22 : vector<1x128xi1> to vector<1x128xi1>
    %24 = vector.broadcast %23 : vector<1x128xi1> to vector<8x128xi1>
    %25 = vector.broadcast %cst_17 : f32 to vector<8x128xf32>
    %26 = arith.select %24, %19, %25 : vector<8x128xi1>, vector<8x128xf32>
    %cst_18 = arith.constant dense<0xFF800000> : vector<8xf32>
    %27 = vector.multi_reduction <maximumf>, %26, %cst_18 [1] : vector<8x128xf32> to vector<8xf32>
    %28 = vector.shape_cast %27 : vector<8xf32> to vector<8x1xf32>
    %29 = vector.broadcast %28 : vector<8x1xf32> to vector<8x128xf32>
    %30 = arith.subf %19, %29 : vector<8x128xf32>
    %cst_19 = arith.constant 0.000000e+00 : f32
    %31 = vector.broadcast %cst_19 : f32 to vector<8x128xf32>
    %32 = arith.minimumf %30, %31 : vector<8x128xf32>
    %33 = math.exp %32 : vector<8x128xf32>
    %cst_20 = arith.constant 0.000000e+00 : f32
    %34 = vector.shape_cast %22 : vector<1x128xi1> to vector<1x128xi1>
    %35 = vector.broadcast %34 : vector<1x128xi1> to vector<8x128xi1>
    %36 = vector.broadcast %cst_20 : f32 to vector<8x128xf32>
    %37 = arith.select %35, %33, %36 : vector<8x128xi1>, vector<8x128xf32>
    %cst_21 = arith.constant dense<0.000000e+00> : vector<8xf32>
    %38 = vector.multi_reduction <add>, %37, %cst_21 [1] : vector<8x128xf32> to vector<8xf32>
    %39 = vector.shape_cast %38 : vector<8xf32> to vector<8x1xf32>
    %40 = vector.broadcast %39 : vector<8x1xf32> to vector<8x128xf32>
    %41 = arith.divf %37, %40 : vector<8x128xf32>
    %42 = vector.shape_cast %22 : vector<1x128xi1> to vector<1x128xi1>
    %43 = vector.broadcast %42 : vector<1x128xi1> to vector<8x128xi1>
    %44 = arith.select %43, %41, %19 : vector<8x128xi1>, vector<8x128xf32>
    %c0_22 = arith.constant 0 : index
    %c0_23 = arith.constant 0 : index
    %45 = vector.load %arg8[%c0_22, %c0_23] : memref<8x128xf32, #tpu.memory_space<vmem>>, vector<8x128xf32>
    tpu.vector_store %arg8[%c0_22, %c0_23], %44 {strides = array<i32>} : memref<8x128xf32, #tpu.memory_space<vmem>>, vector<8x128xf32>,
    return
  }
  func.func @transform_0(%arg0: i32) -> (i32, i32) {
    %c0_i32 = arith.constant 0 : i32
    %c0_i32_0 = arith.constant 0 : i32
    return %arg0, %c0_i32 : i32, i32
  }
  func.func @transform_1(%arg0: i32) -> (i32, i32) {
    %c0_i32 = arith.constant 0 : i32
    %c0_i32_0 = arith.constant 0 : i32
    %c0_i32_1 = arith.constant 0 : i32
    return %c0_i32, %c0_i32_0 : i32, i32
  }
  func.func @transform_2(%arg0: i32) -> (i32, i32) {
    %c0_i32 = arith.constant 0 : i32
    %c0_i32_0 = arith.constant 0 : i32
    %c0_i32_1 = arith.constant 0 : i32
    return %c0_i32, %c0_i32_0 : i32, i32
  }
  func.func @transform_3(%arg0: i32) -> (i32, i32) {
    %c0_i32 = arith.constant 0 : i32
    %c0_i32_0 = arith.constant 0 : i32
    %c0_i32_1 = arith.constant 0 : i32
    return %c0_i32, %c0_i32_0 : i32, i32
  }
  func.func @transform_4(%arg0: i32) -> (i32, i32) {
    %c0_i32 = arith.constant 0 : i32
    %c0_i32_0 = arith.constant 0 : i32
    %c0_i32_1 = arith.constant 0 : i32
    return %c0_i32, %c0_i32_0 : i32, i32
  }
  func.func @transform_5(%arg0: i32) -> (i32, i32) {
    %c0_i32 = arith.constant 0 : i32
    %c0_i32_0 = arith.constant 0 : i32
    %c0_i32_1 = arith.constant 0 : i32
    return %c0_i32, %c0_i32_0 : i32, i32
  }
  func.func @transform_6(%arg0: i32) -> (i32, i32) {
    %c0_i32 = arith.constant 0 : i32
    %c0_i32_0 = arith.constant 0 : i32
    %c0_i32_1 = arith.constant 0 : i32
    return %c0_i32, %c0_i32_0 : i32, i32
  }
  func.func @transform_7(%arg0: i32) -> (i32, i32) {
    %c0_i32 = arith.constant 0 : i32
    %c0_i32_0 = arith.constant 0 : i32
    return %arg0, %c0_i32 : i32, i32
  }
}

</mosaic_0001>

<bundles_post_ra>
// kernel: tpu_custom_call.1
= control target key start
LH: loop header
LB: loop body
LE: loop exit
PB: predicated region body
PF: predicated region fallthrough
CT: control target
= control target key end

     0   :  { %12 = vsyncpa [#allocation3], 0  ;;  %s840_s0 = inlined_call_operand.hbm [shape: f32[8,16], index: 0, kind: input, shape index: {}]   ;;  %s841_s1 = inlined_call_operand.hbm [shape: f32[16,128], index: 1, kind: input, shape index: {}]   ;;  %s842_s2 = inlined_call_operand.vmem [shape: f32[1,128], index: 2, kind: input, shape index: {}]   ;;  %s843_s3 = inlined_call_operand.hbm [shape: f32[128,128], index: 3, kind: input, shape index: {}]   ;;  %s844_s4 = inlined_call_operand.vmem [shape: f32[1,128], index: 4, kind: input, shape index: {}]   ;;  %s845_s5 = inlined_call_operand.hbm [shape: f32[128,128], index: 5, kind: input, shape index: {}]   ;;  %s846_s6 = inlined_call_operand.vmem [shape: f32[1,128], index: 6, kind: input, shape index: {}]   ;;  %s847_s7 = inlined_call_operand.hbm [shape: f32[8,128], index: 7, kind: output, shape index: {}]  }
   0x1   :  { %13 = vsyncpa [#allocation6], 0 }
   0x2   :  { %14 = vsyncpa [#allocation9], 0 }
   0x3   :  { %15 = vsyncpa [#allocation4], 0  ;;  %s689_s24 = smov [#allocation5]   ;;  %s571_s28 = scalar_lea.hbm %s841_s1, 256 }
   0x4   :  { %s31_s25 = sshll.u32 %s689_s24, 4  ;;  %p572_p0 = scmp.ne.s32.totalorder %s841_s1, %s571_s28  ;;  %s32_s25 = int_to_ptr.vmem [resolvable:$true] %s31_s25 }
   0x5   :  { %p575_p1 = scmp.lt.u32.totalorder %s571_s28, %s841_s1 }
   0x7   :  { %p577_p2 = pnand %p575_p1, %p572_p0 }
   0x9   :  { %580 = shalt.err (!%p577_p2)
}
   0xa   :  { %s581_s10 = scalar_lea.vmem %s32_s25, 256  ;;  %p586_p4 = scmp.lt.s32.totalorder %s32_s25, %s32_s25 }
   0xb   :  { %p582_p3 = scmp.ne.s32.totalorder %s32_s25, %s581_s10  ;;  %p587_p5 = scmp.lt.s32.totalorder %s581_s10, %s581_s10 }
   0xd   :  { %p588_p6 = por %p587_p5, %p586_p4 }
   0xf   :  { %p589_p7 = pnand %p588_p6, %p582_p3 }
  0x11   :  { %592 = shalt.err (!%p589_p7)
}
  0x12   :  { %s690_s11 = smov 128   ;;  %s691_s12 = smov 8  }
  0x13   :  { %37 = dma.hbm_to_vmem [thread:$0]  %s841_s1, 256, %s32_s25, [#allocation6], %s690_s11, %s690_s11, %s691_s12  }
  0x14   :  { %s692_s15 = smov [#allocation2]   ;;  %s693_s17 = smov [#allocation7]  }
  0x15   :  { %s22_s16 = sshll.u32 %s692_s15, 4  ;;  %s45_s18 = sshll.u32 %s693_s17, 4  ;;  %s23_s16 = int_to_ptr.vmem [resolvable:$true] %s22_s16  ;;  %s46_s18 = int_to_ptr.vmem [resolvable:$true] %s45_s18 }
  0x16   :  { %s593_s21 = scalar_lea.hbm %s840_s0, 128 }
  0x17   :  { %p594_p8 = scmp.ne.s32.totalorder %s840_s0, %s593_s21  ;;  %p597_p9 = scmp.lt.u32.totalorder %s593_s21, %s840_s0 }
  0x19   :  { %p599_p10 = pnand %p597_p9, %p594_p8 }
  0x1b   :  { %602 = shalt.err (!%p599_p10)
}
  0x1c   :  { %s603_s1 = scalar_lea.vmem %s23_s16, 128  ;;  %p608_p12 = scmp.lt.s32.totalorder %s23_s16, %s23_s16 }
  0x1d   :  { %p604_p11 = scmp.ne.s32.totalorder %s23_s16, %s603_s1  ;;  %p609_p13 = scmp.lt.s32.totalorder %s603_s1, %s603_s1 }
  0x1f   :  { %p610_p0 = por %p609_p13, %p608_p12 }
  0x21   :  { %p611_p1 = pnand %p610_p0, %p604_p11 }
  0x23   :  { %614 = shalt.err (!%p611_p1)
}
  0x24   :  { %25 = dma.hbm_to_vmem [thread:$0]  %s840_s0, 128, %s23_s16, [#allocation3]  }
  0x25   :  { %s615_s30 = scalar_lea.hbm %s843_s3, 2048 }
  0x26   :  { %p616_p2 = scmp.ne.s32.totalorder %s843_s3, %s615_s30  ;;  %p619_p3 = scmp.lt.u32.totalorder %s615_s30, %s843_s3 }
  0x28   :  { %p621_p4 = pnand %p619_p3, %p616_p2 }
  0x2a   :  { %624 = shalt.err (!%p621_p4)
}
  0x2b   :  { %s625_s14 = scalar_lea.vmem %s46_s18, 2048  ;;  %p630_p6 = scmp.lt.s32.totalorder %s46_s18, %s46_s18 }
  0x2c   :  { %p626_p5 = scmp.ne.s32.totalorder %s46_s18, %s625_s14  ;;  %p631_p7 = scmp.lt.s32.totalorder %s625_s14, %s625_s14 }
  0x2e   :  { %p632_p8 = por %p631_p7, %p630_p6 }
  0x30   :  { %p633_p9 = pnand %p632_p8, %p626_p5 }
  0x32   :  { %636 = shalt.err (!%p633_p9)
}
  0x33   :  { %51 = dma.hbm_to_vmem [thread:$0]  %s843_s3, 2048, %s46_s18, [#allocation6], %s690_s11, %s690_s11, %s691_s12  }
  0x34   :  { %s694_s16 = smov [#allocation8]   ;;  %s637_s21 = scalar_lea.hbm %s845_s5, 2048 }
  0x35   :  { %s59_s17 = sshll.u32 %s694_s16, 4  ;;  %p638_p10 = scmp.ne.s32.totalorder %s845_s5, %s637_s21  ;;  %s60_s17 = int_to_ptr.vmem [resolvable:$true] %s59_s17 }
  0x36   :  { %p641_p11 = scmp.lt.u32.totalorder %s637_s21, %s845_s5 }
  0x38   :  { %p643_p12 = pnand %p641_p11, %p638_p10 }
  0x3a   :  { %646 = shalt.err (!%p643_p12)
}
  0x3b   :  { %s647_s1 = scalar_lea.vmem %s60_s17, 2048  ;;  %p652_p0 = scmp.lt.s32.totalorder %s60_s17, %s60_s17 }
  0x3c   :  { %p648_p13 = scmp.ne.s32.totalorder %s60_s17, %s647_s1  ;;  %p653_p1 = scmp.lt.s32.totalorder %s647_s1, %s647_s1 }
  0x3e   :  { %p654_p2 = por %p653_p1, %p652_p0 }
  0x40   :  { %p655_p3 = pnand %p654_p2, %p648_p13 }
  0x42   :  { %658 = shalt.err (!%p655_p3)
}
  0x43   :  { %65 = dma.hbm_to_vmem [thread:$0]  %s845_s5, 2048, %s60_s17, [#allocation9], %s690_s11, %s690_s11, %s691_s12  }
  0x44   :  { %681 = dma.done.wait [#allocation3], 128  }
  0x45   :  { %682 = vsyncadd [#allocation3], 4294967168 }
  0x46   :  { %683 = dma.done.wait [#allocation6], 2304  }
  0x47   :  { %684 = vsyncadd [#allocation6], 4294964992 }
  0x48   :  { %685 = dma.done.wait [#allocation9], 2048  }
  0x49   :  { %686 = vsyncadd [#allocation9], 4294965248  ;;  %v695_v0 = vmov 0.0|0.0   ;;  %vm696_vm0 = vmmov 0   ;;  %v697_v1 = vmov 0.0   ;;  %v81_v2 = vld [vmem:[#allocation5] sm:$0xff] }
  0x4a   :  { %506 = vmatprep.subr.bf16.mxu0 %v695_v0  ;;  %433 = vmatprep.mubr.msk.f32.mxu0 %vm696_vm0, %v697_v1  ;;  %v82_v3 = vld [vmem:[#allocation5 + $0x8] sm:$0xff]  ;;  %v165_v5 = vld [vmem:[#allocation7] sm:$0xff]  ;;  %v166_v6 = vld [vmem:[#allocation7 + $0x8] sm:$0xff]  ;;  %vm90_vm1 = vcmask 130048  }
  0x4b   :  { %509 = vmatprep.subr.bf16.mxu1 %v695_v0  ;;  %468 = vmatprep.mubr.msk.f32.mxu1 %vm696_vm0, %v697_v1  ;;  %v507_v4 = vpack.c.bf16 %v82_v3, %v81_v2  ;;  %v167_v7 = vld [vmem:[#allocation7 + $0x10] sm:$0xff]  ;;  %v510_v8 = vpack.c.bf16 %v166_v6, %v165_v5  ;;  %v168_v9 = vld [vmem:[#allocation7 + $0x18] sm:$0xff]  ;;  %v80_v10 = vld [vmem:[#allocation2] sm:$0xff] }
  0x4c   :  { %v513_v11 = vpack.c.bf16 %v168_v9, %v167_v7  ;;  %v169_v12 = vld [vmem:[#allocation7 + $0x20] sm:$0xff]  ;;  %v170_v13 = vld [vmem:[#allocation7 + $0x28] sm:$0xff]  ;;  %v171_v15 = vld [vmem:[#allocation7 + $0x30] sm:$0xff] }
  0x4d   :  { %508 = vmatpush3.bf16.msra.mxu0 %v507_v4  ;;  %511 = vmatpush3.bf16.msra.mxu1 %v510_v8  ;;  %v516_v14 = vpack.c.bf16 %v170_v13, %v169_v12  ;;  %v172_v16 = vld [vmem:[#allocation7 + $0x38] sm:$0xff]  ;;  %v173_v18 = vld [vmem:[#allocation7 + $0x40] sm:$0xff]  ;;  %v174_v19 = vld [vmem:[#allocation7 + $0x48] sm:$0xff] }
  0x4e   :  { %533 = vmatprep.subr.bf16.mxu0 %v695_v0  ;;  %512 = vmatprep.subr.bf16.mxu1 %v695_v0  ;;  %v519_v17 = vpack.c.bf16 %v172_v16, %v171_v15  ;;  %v522_v20 = vpack.c.bf16 %v174_v19, %v173_v18  ;;  %v175_v21 = vld [vmem:[#allocation7 + $0x50] sm:$0xff]  ;;  %v176_v22 = vld [vmem:[#allocation7 + $0x58] sm:$0xff]  ;;  %v177_v24 = vld [vmem:[#allocation7 + $0x60] sm:$0xff] }
  0x4f   :  { %v525_v23 = vpack.c.bf16 %v176_v22, %v175_v21  ;;  %v178_v25 = vld [vmem:[#allocation7 + $0x68] sm:$0xff]  ;;  %v179_v27 = vld [vmem:[#allocation7 + $0x70] sm:$0xff]  ;;  %v180_v28 = vld [vmem:[#allocation7 + $0x78] sm:$0xff] }
  0x50   :  { %434 = vmatmul.mubr.msk.f32.vlgmr.msra.gmra.mrb[0].mxu0 %vm90_vm1, %v80_v10  ;;  %v528_v26 = vpack.c.bf16 %v178_v25, %v177_v24  ;;  %v531_v29 = vpack.c.bf16 %v180_v28, %v179_v27  ;;  %v259_v30 = vld [vmem:[#allocation8] sm:$0xff]  ;;  %v260_v31 = vld [vmem:[#allocation8 + $0x8] sm:$0xff]  ;;  %v261_v32 = vld [vmem:[#allocation8 + $0x10] sm:$0xff] }
  0x51   :  { %503 = vmatprep.mubr.msk.f32.mxu0 %vm696_vm0, %v697_v1  ;;  %514 = vmatpush3.bf16.msra.mxu1 %v513_v11  ;;  %v534_v33 = vpack.c.bf16 %v260_v31, %v259_v30  ;;  %v262_v34 = vld [vmem:[#allocation8 + $0x18] sm:$0xff]  ;;  %v263_v36 = vld [vmem:[#allocation8 + $0x20] sm:$0xff]  ;;  %v264_v37 = vld [vmem:[#allocation8 + $0x28] sm:$0xff] }
  0x52   :  { %515 = vmatprep.subr.bf16.mxu1 %v695_v0  ;;  %v537_v35 = vpack.c.bf16 %v262_v34, %v261_v32  ;;  %v540_v38 = vpack.c.bf16 %v264_v37, %v263_v36  ;;  %v265_v39 = vld [vmem:[#allocation8 + $0x30] sm:$0xff]  ;;  %v266_v40 = vld [vmem:[#allocation8 + $0x38] sm:$0xff]  ;;  %v267_v42 = vld [vmem:[#allocation8 + $0x40] sm:$0xff] }
  0x53   :  { %535 = vmatpush3.bf16.msra.mxu0 %v534_v33  ;;  %v543_v41 = vpack.c.bf16 %v266_v40, %v265_v39  ;;  %v268_v43 = vld [vmem:[#allocation8 + $0x48] sm:$0xff]  ;;  %v269_v45 = vld [vmem:[#allocation8 + $0x50] sm:$0xff]  ;;  %v270_v46 = vld [vmem:[#allocation8 + $0x58] sm:$0xff] }
  0x54   :  { %536 = vmatprep.subr.bf16.mxu0 %v695_v0  ;;  %v546_v44 = vpack.c.bf16 %v268_v43, %v267_v42  ;;  %v549_v47 = vpack.c.bf16 %v270_v46, %v269_v45  ;;  %v271_v48 = vld [vmem:[#allocation8 + $0x60] sm:$0xff]  ;;  %v272_v49 = vld [vmem:[#allocation8 + $0x68] sm:$0xff]  ;;  %v273_v56 = vld [vmem:[#allocation8 + $0x70] sm:$0xff] }
  0x55   :  { %517 = vmatpush3.bf16.msra.mxu1 %v516_v14  ;;  %v552_v50 = vpack.c.bf16 %v272_v49, %v271_v48  ;;  %v388_v51 = vld [vmem:[%s842_s2] ss:$0 sm:$0xff]  ;;  %v274_v57 = vld [vmem:[#allocation8 + $0x78] sm:$0xff] }
  0x56   :  { %518 = vmatprep.subr.bf16.mxu1 %v695_v0  ;;  %v555_v58 = vpack.c.bf16 %v274_v57, %v273_v56  ;;  %v390_v59 = vld [vmem:[%s844_s4] ss:$0 sm:$0xff]  ;;  %s698_s4 = smov [#allocation10]  }
  0x57   :  { %538 = vmatpush3.bf16.msra.mxu0 %v537_v35  ;;  %v391_v2 = vld [vmem:[%s846_s6] ss:$0 sm:$0xff]  ;;  %s377_s6 = sshll.u32 %s698_s4, 4  ;;  %s378_s6 = int_to_ptr.vmem [resolvable:$true] %s377_s6 }
  0x58   :  { %539 = vmatprep.subr.bf16.mxu0 %v695_v0  ;;  %s659_s28 = scalar_lea.vmem %s378_s6, 128  ;;  %p664_p5 = scmp.lt.s32.totalorder %s378_s6, %s378_s6 }
  0x59   :  { %520 = vmatpush3.bf16.msra.mxu1 %v519_v17  ;;  %p660_p4 = scmp.ne.s32.totalorder %s378_s6, %s659_s28  ;;  %p665_p6 = scmp.lt.s32.totalorder %s659_s28, %s659_s28 }
  0x5a   :  { %521 = vmatprep.subr.bf16.mxu1 %v695_v0 }
  0x5b   :  { %541 = vmatpush3.bf16.msra.mxu0 %v540_v38  ;;  %p666_p7 = por %p665_p6, %p664_p5 }
  0x5c   :  { %542 = vmatprep.subr.bf16.mxu0 %v695_v0 }
  0x5d   :  { %523 = vmatpush3.bf16.msra.mxu1 %v522_v20  ;;  %p667_p8 = pnand %p666_p7, %p660_p4 }
  0x5e   :  { %524 = vmatprep.subr.bf16.mxu1 %v695_v0 }
  0x5f   :  { %544 = vmatpush3.bf16.msra.mxu0 %v543_v41 }
  0x60   :  { %545 = vmatprep.subr.bf16.mxu0 %v695_v0 }
  0x61   :  { %526 = vmatpush3.bf16.msra.mxu1 %v525_v23 }
  0x62   :  { %527 = vmatprep.subr.bf16.mxu1 %v695_v0 }
  0x63   :  { %547 = vmatpush3.bf16.msra.mxu0 %v546_v44 }
  0x64   :  { %548 = vmatprep.subr.bf16.mxu0 %v695_v0 }
  0x65   :  { %529 = vmatpush3.bf16.msra.mxu1 %v528_v26 }
  0x66   :  { %530 = vmatprep.subr.bf16.mxu1 %v695_v0 }
  0x67   :  { %550 = vmatpush3.bf16.msra.mxu0 %v549_v47 }
  0x68   :  { %551 = vmatprep.subr.bf16.mxu0 %v695_v0 }
  0x69   :  { %532 = vmatpush3.bf16.msra.mxu1 %v531_v29 }
  0x6b   :  { %553 = vmatpush3.bf16.msra.mxu0 %v552_v50 }
  0x6c   :  { %554 = vmatprep.subr.bf16.mxu0 %v695_v0  ;;  %v352_v0 = vlaneseq }
  0x6e   :  { %v353_v1 = vand.u32 127, %v352_v0 }
  0x6f   :  { %556 = vmatpush3.bf16.msra.mxu0 %v555_v58 }
  0x70   :  { %vm354_vm2 = vcmp.lt.s32.totalorder %v353_v1, 8 }
 0x123   :  { %v160_v52 = vpop.f32.mrb[0].mxu0 }
 0x124   :  { %v161_v53 = vadd.f32 %v388_v51, %v160_v52  ;;  %v435_v54 = vpop.f32.mrb[1].mxu0 }
 0x126   :  { %v164_v55 = vmax.f32 %v161_v53, 0.0 }
 0x128   :  { %469 = vmatmul.mubr.f32.vlgmr.msra.gmra.mrb[0].mxu1 %v164_v55 }
 0x1fb   :  { %v254_v60 = vpop.f32.mrb[0].mxu1 }
 0x1fc   :  { %v255_v61 = vadd.f32 %v390_v59, %v254_v60  ;;  %v470_v62 = vpop.f32.mrb[1].mxu1 }
 0x1fe   :  { %v258_v63 = vmax.f32 %v255_v61, 0.0 }
 0x200   :  { %504 = vmatmul.mubr.f32.vlgmr.msra.gmra.mrb[2].mxu0 %v258_v63 }
 0x2d3   :  { %v348_v3 = vpop.f32.mrb[2].mxu0 }
 0x2d4   :  { %v349_v4 = vadd.f32 %v391_v2, %v348_v3  ;;  %v505_v5 = vpop.f32.mrb[3].mxu0 }
 0x2d6   :  { %v357_v6 = vsel %vm354_vm2, %v349_v4, -inf }
 0x2d7   :  { %358 = vmax.xlane.f32.xlu0 %v357_v6 }
 0x364   :  { %v359_v7 = vpop.xlane.xlu0 %358 }
 0x365   :  { %v360_v8 = vsub.f32 %v349_v4, %v359_v7 }
 0x367   :  { %v361_v9 = vmin.f32 %v360_v8, 0.0 }
 0x369   :  { %v362_v10 = vmul.f32 1.442695, %v361_v9 }
 0x36b   :  { %567 = vpow2.f32 %v362_v10 }
 0x375   :  { %v568_v11 = vpop.eup %567 }
 0x376   :  { %v364_v12 = vsel %vm354_vm2, %v568_v11, 0.0 }
 0x377   :  { %365 = vadd.xlane.f32.xlu0 %v364_v12 }
 0x404   :  { %v366_v13 = vpop.xlane.xlu0 %365 }
 0x405   :  { %569 = vrcp.f32 %v366_v13 }
 0x40f   :  { %v570_v14 = vpop.eup %569 }
 0x410   :  { %v368_v15 = vmul.f32 %v570_v14, %v364_v12 }
 0x412   :  { %v369_v16 = vsel %vm354_vm2, %v368_v15, %v349_v4 }
 0x413   :  { %370 = vst [vmem:[#allocation10] sm:$0xff] %v369_v16 }
 0x414   :  { %670 = shalt.err (!%p667_p8)
}
 0x415   :  { %s671_s8 = scalar_lea.hbm %s847_s7, 128 }
 0x416   :  { %p672_p9 = scmp.ne.s32.totalorder %s847_s7, %s671_s8  ;;  %p675_p10 = scmp.lt.u32.totalorder %s671_s8, %s847_s7 }
 0x418   :  { %p677_p11 = pnand %p675_p10, %p672_p9 }
 0x41a   :  { %680 = shalt.err (!%p677_p11)
}
 0x41b   :  { %380 = dma.vmem_to_hbm [thread:$0]  %s378_s6, 128, %s847_s7, [#allocation4]  }
 0x41c   :  { %687 = dma.done.wait [#allocation4], 128  }
 0x41d   :  { %688 = vsyncadd [#allocation4], 4294967168 }
 0x41e   :  { %384 = vsyncpa [#allocation3], 1 }
 0x41f   :  { %385 = vsyncpa [#allocation6], 1 }
 0x420   :  { %386 = vsyncpa [#allocation9], 1 }
 0x421   :  { %387 = vsyncpa [#allocation4], 1 }

</bundles_post_ra>
